<compile_context>
chip_gen: v7x
topology: tpu7x:2x2x1
jax: 0.10.0
libtpu: 0.0.40
codegen_flags: <defaults>
</compile_context>

<pallas_src>
import functools
import math

import jax
import jax.numpy as jnp
from jax.experimental import pallas as pl
from jax.experimental.pallas import tpu as pltpu


# ---------------------------------------------------------------------------
# small helpers
# ---------------------------------------------------------------------------

def _ceil_to(x, m):
    return ((x + m - 1) // m) * m


def _pad128(c):
    return _ceil_to(c, 128)


def _pick_tm(m):
    """M tile: pick a big tile first and pad M up to it (fixes the tm=8 degeneracy)."""
    if m >= 2048:
        tm = 512
    elif m >= 256:
        tm = 256
    else:
        tm = _ceil_to(max(m, 1), 8)
    return tm, _ceil_to(m, tm)


def _pick_tk(kp):
    """Contraction tile: full K when it fits VMEM (deep MXU), else a large divisor."""
    if kp <= 1536:
        return kp
    return next(c for c in (1024, 768, 512, 384, 256, 128) if kp % c == 0)


def _pick_tn(nb, m_tiles):
    """Lane-dense full-width output when it fits; keep >=2 tiles on a parallel axis."""
    if nb <= 1536:
        tn = nb
    else:
        tn = next(c for c in (512, 384, 256, 128) if nb % c == 0)
    if m_tiles < 2 and tn == nb and nb >= 512 and (nb // 2) % 128 == 0:
        tn = nb // 2          # give 2-TensorCore chips a second parallel tile
    return tn


# in-kernel activations (EUP exp + approx reciprocal; clamped for robustness)
def _silu(y):
    t = jnp.exp(-jnp.maximum(y, -30.0))
    return y * pl.reciprocal(1.0 + t, approx=True)


def _sigmoid(y):
    t = jnp.exp(-jnp.maximum(y, -30.0))
    return pl.reciprocal(1.0 + t, approx=True)


def _apply_act(y, act):
    if act == "silu":
        return _silu(y)
    if act == "sigmoid":
        return _sigmoid(y)
    if act == "tanh":
        return jnp.tanh(y)
    return y


# ---------------------------------------------------------------------------
# Pallas kernels
# ---------------------------------------------------------------------------

def _mm_kernel(a_ref, b_ref, s_ref, c_ref, *rest, act, has_res):
    """Tiled bf16 matmul, f32 acc, fused scale/bias + act (+ residual) epilogue."""
    if has_res:
        r_ref, o_ref, acc_ref = rest
    else:
        r_ref = None
        o_ref, acc_ref = rest

    @pl.when(pl.program_id(2) == 0)
    def _init():
        acc_ref[...] = jnp.zeros_like(acc_ref)

    acc_ref[...] += jnp.dot(a_ref[...], b_ref[...],
                            preferred_element_type=jnp.float32)

    @pl.when(pl.program_id(2) == pl.num_programs(2) - 1)
    def _fin():
        y = acc_ref[...] * s_ref[...] + c_ref[...]
        y = _apply_act(y, act)
        if has_res:
            y = y + r_ref[...].astype(jnp.float32)
        o_ref[...] = y.astype(o_ref.dtype)


def _proj_kernel(a_ref, se_ref, b_ref, s_ref, c_ref, *rest, has_res):
    """Batched 1x1 projection: grid (n, i, k), full-Cout output block.  The SE channel
    scale is applied once per (i, k) A tile (bf16), folded BN and the residual add are
    fused into the epilogue."""
    if has_res:
        r_ref, o_ref, acc_ref = rest
    else:
        r_ref = None
        o_ref, acc_ref = rest
    k = pl.program_id(2)

    @pl.when(k == 0)
    def _init():
        acc_ref[...] = jnp.zeros_like(acc_ref)

    a = a_ref[0] * se_ref[0]                               # bf16 (tm, tk) * (1, tk)
    acc_ref[...] += jnp.dot(a, b_ref[...], preferred_element_type=jnp.float32)

    @pl.when(k == pl.num_programs(2) - 1)
    def _fin():
        y = acc_ref[...] * s_ref[...] + c_ref[...]
        if has_res:
            y = y + r_ref[0].astype(jnp.float32)
        o_ref[0] = y.astype(o_ref.dtype)


def _c3s1_kernel(*refs, rb, wo, act, has_res):
    """3x3 stride-1 conv: taps gathered from row-shifted input views; the 3 dx taps per
    dy are concatenated along the lane axis so each output row needs only 3 MXU matmuls
    of depth 3*Cin.  Folded BN + activation (+ residual) fused."""
    x_refs = refs[:rb + 2]
    w_ref, s_ref, c_ref = refs[rb + 2:rb + 5]
    if has_res:
        r_ref, o_ref = refs[rb + 5], refs[rb + 6]
    else:
        r_ref, o_ref = None, refs[rb + 5]
    for r in range(rb):
        acc = None
        for dy in range(3):
            row = x_refs[r + dy][0, 0, :, :]               # (Wp, Cin_p) bf16
            deep = jnp.concatenate(
                [row[0:wo, :], row[1:wo + 1, :], row[2:wo + 2, :]], axis=-1)
            part = jnp.dot(deep, w_ref[dy],
                           preferred_element_type=jnp.float32)
            acc = part if acc is None else acc + part
        y = acc * s_ref[...] + c_ref[...]
        y = _apply_act(y, act)
        if has_res:
            y = y + r_ref[0, r, :, :].astype(jnp.float32)
        o_ref[0, r, :, :] = y.astype(o_ref.dtype)


def _dws1_kernel(x_ref, w_ref, s_ref, c_ref, o_ref, *, ho, wo):
    """Depthwise 3x3 stride-1: halo block in VMEM, upcast once, 9 shifted taps,
    BN + SiLU fused."""
    xf = x_ref[0].astype(jnp.float32)                      # (Hp, Wp, ct) upcast once
    acc = None
    for dy in range(3):
        for dx in range(3):
            tap = xf[dy:dy + ho, dx:dx + wo, :] * w_ref[3 * dy + dx]
            acc = tap if acc is None else acc + tap
    y = acc * s_ref[...] + c_ref[...]
    o_ref[0] = _silu(y).astype(o_ref.dtype)


def _dwpatch_kernel(p_ref, w_ref, s_ref, c_ref, o_ref):
    """Depthwise 3x3 via pre-stacked patches (stride-2 layers only)."""
    acc = p_ref[0].astype(jnp.float32) * w_ref[0]
    for t in range(1, 9):
        acc = acc + p_ref[t].astype(jnp.float32) * w_ref[t]
    y = acc * s_ref[...] + c_ref[...]
    o_ref[...] = _silu(y).astype(o_ref.dtype)


def _se_kernel(x_ref, w1_ref, b1_ref, w2_ref, b2_ref, o_ref, *, inv):
    """Fused Squeeze-Excitation: global average pool + FC/SiLU + FC/sigmoid per image."""
    pooled = jnp.sum(x_ref[0].astype(jnp.float32), axis=0, keepdims=True) * inv
    h = jnp.dot(pooled.astype(jnp.bfloat16), w1_ref[...],
                preferred_element_type=jnp.float32) + b1_ref[...]
    h = _silu(h)
    g = jnp.dot(h.astype(jnp.bfloat16), w2_ref[...],
                preferred_element_type=jnp.float32) + b2_ref[...]
    o_ref[0] = _sigmoid(g)


def _pool_kernel(x_ref, o_ref, *, inv):
    # (N, HW, Ct) -> (N, Ct) global average pool over HW (f32 accumulation).
    o_ref[...] = jnp.sum(x_ref[...].astype(jnp.float32), axis=1) * inv


# ---------------------------------------------------------------------------
# Pallas wrappers
# ---------------------------------------------------------------------------

@functools.partial(jax.jit, static_argnames=("act", "out_dtype"))
def matmul_fused(a, b, scale, bias, res=None, act="linear", out_dtype=jnp.bfloat16):
    """(M,K) @ (K,N) with bf16 MXU operands, f32 acc, fused BN/act/residual epilogue."""
    M, K = a.shape
    Kb, Nb = b.shape
    Kp = _ceil_to(Kb, 128)
    tm, Mp = _pick_tm(M)
    tk = _pick_tk(Kp)
    tn = _pick_tn(Nb, Mp // tm)

    a_p = a
    if Mp != M or Kp != K:
        a_p = jnp.pad(a, ((0, Mp - M), (0, Kp - K)))
    a_p = a_p.astype(jnp.bfloat16)
    b_p = b if Kp == Kb else jnp.pad(b, ((0, Kp - Kb), (0, 0)))
    b_p = b_p.astype(jnp.bfloat16)
    s2 = scale.reshape(1, Nb).astype(jnp.float32)
    c2 = bias.reshape(1, Nb).astype(jnp.float32)

    has_res = res is not None
    in_specs = [
        pl.BlockSpec((tm, tk), lambda i, j, k: (i, k)),
        pl.BlockSpec((tk, tn), lambda i, j, k: (k, j)),
        pl.BlockSpec((1, tn), lambda i, j, k: (0, j)),
        pl.BlockSpec((1, tn), lambda i, j, k: (0, j)),
    ]
    inputs = [a_p, b_p, s2, c2]
    if has_res:
        r_p = res if Mp == M else jnp.pad(res, ((0, Mp - M), (0, 0)))
        in_specs.append(pl.BlockSpec((tm, tn), lambda i, j, k: (i, j)))
        inputs.append(r_p)

    out = pl.pallas_call(
        functools.partial(_mm_kernel, act=act, has_res=has_res),
        out_shape=jax.ShapeDtypeStruct((Mp, Nb), out_dtype),
        grid_spec=pltpu.PrefetchScalarGridSpec(
            num_scalar_prefetch=0,
            grid=(Mp // tm, Nb // tn, Kp // tk),
            in_specs=in_specs,
            out_specs=pl.BlockSpec((tm, tn), lambda i, j, k: (i, j)),
            scratch_shapes=[pltpu.VMEM((tm, tn), jnp.float32)],
        ),
        compiler_params=pltpu.CompilerParams(
            dimension_semantics=("parallel", "parallel", "arbitrary")),
    )(*inputs)
    return out[:M] if Mp != M else out


@jax.jit
def project_se_matmul(a3, se, b, scale, bias, res3=None):
    """Batched (N,HW,K) @ (K,C) projection with SE gate + residual fused in-kernel.
    Grid is (n, i, k) with a full-Cout output block so the SE scale is applied once
    per A tile and the output store is lane-dense."""
    N, HW, Kp = a3.shape
    _, Nb = b.shape
    tm, HWp = _pick_tm(HW)
    tk = _pick_tk(Kp)

    a_p = a3 if HWp == HW else jnp.pad(a3, ((0, 0), (0, HWp - HW), (0, 0)))
    a_p = a_p.astype(jnp.bfloat16)
    se3 = se.reshape(N, 1, Kp).astype(jnp.bfloat16)
    s2 = scale.reshape(1, Nb).astype(jnp.float32)
    c2 = bias.reshape(1, Nb).astype(jnp.float32)

    has_res = res3 is not None
    in_specs = [
        pl.BlockSpec((1, tm, tk), lambda n, i, k: (n, i, k)),
        pl.BlockSpec((1, 1, tk), lambda n, i, k: (n, 0, k)),
        pl.BlockSpec((tk, Nb), lambda n, i, k: (k, 0)),
        pl.BlockSpec((1, Nb), lambda n, i, k: (0, 0)),
        pl.BlockSpec((1, Nb), lambda n, i, k: (0, 0)),
    ]
    inputs = [a_p, se3, b.astype(jnp.bfloat16), s2, c2]
    if has_res:
        r_p = res3 if HWp == HW else jnp.pad(res3, ((0, 0), (0, HWp - HW), (0, 0)))
        in_specs.append(pl.BlockSpec((1, tm, Nb), lambda n, i, k: (n, i, 0)))
        inputs.append(r_p)

    out = pl.pallas_call(
        functools.partial(_proj_kernel, has_res=has_res),
        out_shape=jax.ShapeDtypeStruct((N, HWp, Nb), jnp.bfloat16),
        grid_spec=pltpu.PrefetchScalarGridSpec(
            num_scalar_prefetch=0,
            grid=(N, HWp // tm, Kp // tk),
            in_specs=in_specs,
            out_specs=pl.BlockSpec((1, tm, Nb), lambda n, i, k: (n, i, 0)),
            scratch_shapes=[pltpu.VMEM((tm, Nb), jnp.float32)],
        ),
        compiler_params=pltpu.CompilerParams(
            dimension_semantics=("parallel", "parallel", "arbitrary")),
    )(*inputs)
    return out[:, :HW] if HWp != HW else out


@functools.partial(jax.jit, static_argnames=("act",))
def conv3x3_s1(x, p, res=None, act="silu"):
    """3x3 / stride-1 / pad-1 conv + folded BN + act (+ residual).  Taps gathered from
    row-shifted BlockSpec views (no 9x im2col in HBM); 3 deep matmuls per output row."""
    N, H, W, Cp = x.shape
    w9 = p["w"]                                            # (9, Cp, Coutp) bf16
    Coutp = w9.shape[-1]
    w3 = w9.reshape(3, 3 * Cp, Coutp)                      # contiguous view (no copy)
    xp = jnp.pad(x, ((0, 0), (1, 1), (1, 1), (0, 0)))
    Wp = W + 2
    rb = next(r for r in (32, 28, 16, 14, 8, 7, 4, 2, 1) if H % r == 0)
    s2 = p["scale"].reshape(1, Coutp)
    c2 = p["bias"].reshape(1, Coutp)
    has_res = res is not None

    in_specs = [pl.BlockSpec((1, 1, Wp, Cp),
                             (lambda n, h, dy=dy: (n, h * rb + dy, 0, 0)))
                for dy in range(rb + 2)]
    inputs = [xp] * (rb + 2)
    in_specs += [
        pl.BlockSpec((3, 3 * Cp, Coutp), lambda n, h: (0, 0, 0)),
        pl.BlockSpec((1, Coutp), lambda n, h: (0, 0)),
        pl.BlockSpec((1, Coutp), lambda n, h: (0, 0)),
    ]
    inputs += [w3, s2, c2]
    if has_res:
        in_specs.append(pl.BlockSpec((1, rb, W, Coutp), lambda n, h: (n, h, 0, 0)))
        inputs.append(res)

    return pl.pallas_call(
        functools.partial(_c3s1_kernel, rb=rb, wo=W, act=act, has_res=has_res),
        out_shape=jax.ShapeDtypeStruct((N, H, W, Coutp), jnp.bfloat16),
        grid_spec=pltpu.PrefetchScalarGridSpec(
            num_scalar_prefetch=0,
            grid=(N, H // rb),
            in_specs=in_specs,
            out_specs=pl.BlockSpec((1, rb, W, Coutp), lambda n, h: (n, h, 0, 0)),
        ),
        compiler_params=pltpu.CompilerParams(
            dimension_semantics=("parallel", "parallel")),
    )(*inputs)


@functools.partial(jax.jit, static_argnames=("stride", "act"))
def conv3x3_im2col(x, p, stride=2, act="silu"):
    """3x3 conv via im2col + fused Pallas matmul (stem + the 2 stride-2 fused convs)."""
    w9 = p["w"]                                            # (9, Cin, Coutp)
    _, Cin_w, Coutp = w9.shape
    N, H, W, Cin = x.shape
    xp = jnp.pad(x, ((0, 0), (1, 1), (1, 1), (0, 0)))
    Ho = (H - 1) // stride + 1
    Wo = (W - 1) // stride + 1
    cols = []
    for dy in range(3):
        for dx in range(3):
            cols.append(xp[:, dy:dy + stride * Ho:stride,
                           dx:dx + stride * Wo:stride, :])
    a = jnp.concatenate(cols, axis=-1).reshape(N * Ho * Wo, 9 * Cin)
    out = matmul_fused(a, w9.reshape(9 * Cin_w, Coutp),
                       p["scale"], p["bias"], act=act)
    return out.reshape(N, Ho, Wo, Coutp)


@jax.jit
def dwconv_s1(x, p):
    """Depthwise 3x3 / stride-1 / pad-1 + folded BN + SiLU (halo block in-kernel)."""
    N, H, W, Cp = x.shape
    xp = jnp.pad(x, ((0, 0), (1, 1), (1, 1), (0, 0)))
    Hp, Wp = H + 2, W + 2
    budget = 6 * 1024 * 1024                               # bf16 bytes for one halo block
    if Hp * Wp * Cp * 2 <= budget:
        ct = Cp                                            # whole-channel tile
    else:
        ct = next((c for c in (1024, 512, 256, 128)
                   if Cp % c == 0 and Hp * Wp * c * 2 <= budget), 128)
    w3 = p["w"].reshape(9, 1, Cp)
    s2 = p["scale"].reshape(1, Cp)
    c2 = p["bias"].reshape(1, Cp)
    return pl.pallas_call(
        functools.partial(_dws1_kernel, ho=H, wo=W),
        out_shape=jax.ShapeDtypeStruct((N, H, W, Cp), jnp.bfloat16),
        grid_spec=pltpu.PrefetchScalarGridSpec(
            num_scalar_prefetch=0,
            grid=(N, Cp // ct),
            in_specs=[
                pl.BlockSpec((1, Hp, Wp, ct), lambda n, c: (n, 0, 0, c)),
                pl.BlockSpec((9, 1, ct), lambda n, c: (0, 0, c)),
                pl.BlockSpec((1, ct), lambda n, c: (0, c)),
                pl.BlockSpec((1, ct), lambda n, c: (0, c)),
            ],
            out_specs=pl.BlockSpec((1, H, W, ct), lambda n, c: (n, 0, 0, c)),
        ),
        compiler_params=pltpu.CompilerParams(
            dimension_semantics=("parallel", "parallel")),
    )(xp, w3, s2, c2)


@jax.jit
def dwconv_s2(x, p):
    """Depthwise 3x3 / stride-2 via patch stacking (only 2 such layers in the net)."""
    N, H, W, Cp = x.shape
    xp = jnp.pad(x, ((0, 0), (1, 1), (1, 1), (0, 0)))
    Ho = (H - 1) // 2 + 1
    Wo = (W - 1) // 2 + 1
    pats = []
    for dy in range(3):
        for dx in range(3):
            pats.append(xp[:, dy:dy + 2 * Ho:2, dx:dx + 2 * Wo:2, :]
                        .reshape(N * Ho * Wo, Cp))
    patches = jnp.stack(pats, axis=0)                      # (9, M, Cp) bf16
    M = N * Ho * Wo
    tm, Mp = _pick_tm(M)
    if Mp != M:
        patches = jnp.pad(patches, ((0, 0), (0, Mp - M), (0, 0)))
    tc = next(c for c in (512, 384, 256, 128) if Cp % c == 0)
    w3 = p["w"].reshape(9, 1, Cp)
    s2 = p["scale"].reshape(1, Cp)
    c2 = p["bias"].reshape(1, Cp)
    out = pl.pallas_call(
        _dwpatch_kernel,
        out_shape=jax.ShapeDtypeStruct((Mp, Cp), jnp.bfloat16),
        grid_spec=pltpu.PrefetchScalarGridSpec(
            num_scalar_prefetch=0,
            grid=(Mp // tm, Cp // tc),
            in_specs=[
                pl.BlockSpec((9, tm, tc), lambda i, j: (0, i, j)),
                pl.BlockSpec((9, 1, tc), lambda i, j: (0, 0, j)),
                pl.BlockSpec((1, tc), lambda i, j: (0, j)),
                pl.BlockSpec((1, tc), lambda i, j: (0, j)),
            ],
            out_specs=pl.BlockSpec((tm, tc), lambda i, j: (i, j)),
        ),
        compiler_params=pltpu.CompilerParams(
            dimension_semantics=("parallel", "parallel")),
    )(patches, w3, s2, c2)
    return out[:M].reshape(N, Ho, Wo, Cp)


@jax.jit
def se_gates(y3, se):
    """Fused SE block: global average pool + squeeze/excite FCs -> (N, 1, Ce) f32 gate."""
    N, HW, Ce = y3.shape
    w1, w2 = se["w1"], se["w2"]
    Csq = w1.shape[1]
    b1 = se["b1"].reshape(1, Csq)
    b2 = se["b2"].reshape(1, Ce)
    return pl.pallas_call(
        functools.partial(_se_kernel, inv=1.0 / HW),
        out_shape=jax.ShapeDtypeStruct((N, 1, Ce), jnp.float32),
        grid_spec=pltpu.PrefetchScalarGridSpec(
            num_scalar_prefetch=0,
            grid=(N,),
            in_specs=[
                pl.BlockSpec((1, HW, Ce), lambda n: (n, 0, 0)),
                pl.BlockSpec((Ce, Csq), lambda n: (0, 0)),
                pl.BlockSpec((1, Csq), lambda n: (0, 0)),
                pl.BlockSpec((Csq, Ce), lambda n: (0, 0)),
                pl.BlockSpec((1, Ce), lambda n: (0, 0)),
            ],
            out_specs=pl.BlockSpec((1, 1, Ce), lambda n: (n, 0, 0)),
        ),
        compiler_params=pltpu.CompilerParams(dimension_semantics=("parallel",)),
    )(y3.astype(jnp.bfloat16), w1, b1, w2, b2)


@jax.jit
def global_avgpool(x3):
    """(N, HW, Cp) -> (N, Cp) mean over HW (head pooling)."""
    N, HW, Cp = x3.shape
    ct = 256 if Cp % 256 == 0 else 128
    return pl.pallas_call(
        functools.partial(_pool_kernel, inv=1.0 / HW),
        out_shape=jax.ShapeDtypeStruct((N, Cp), jnp.float32),
        grid_spec=pltpu.PrefetchScalarGridSpec(
            num_scalar_prefetch=0,
            grid=(Cp // ct,),
            in_specs=[pl.BlockSpec((N, HW, ct), lambda c: (0, 0, c))],
            out_specs=pl.BlockSpec((N, ct), lambda c: (0, c)),
        ),
        compiler_params=pltpu.CompilerParams(dimension_semantics=("parallel",)),
    )(x3)


# ---------------------------------------------------------------------------
# EfficientNetV2-L architecture (torchvision config) + synthetic parameters
# ---------------------------------------------------------------------------

# (block_type, expand_ratio, kernel, stride, in_c, out_c, num_layers)
V2_L_CONFIG = [
    ("fused", 1, 3, 1, 32, 32, 4),
    ("fused", 4, 3, 2, 32, 64, 7),
    ("fused", 4, 3, 2, 64, 96, 7),
    ("mb",    4, 3, 2, 96, 192, 10),
    ("mb",    6, 3, 1, 192, 224, 19),
    ("mb",    6, 3, 2, 224, 384, 25),
    ("mb",    6, 3, 1, 384, 640, 7),
]

_BN_GAMMA = 0.5  # folded-BN scale (kept < 1 so the deep random net stays tame)


class _KeyGen:
    def __init__(self, seed):
        self._root = jax.random.PRNGKey(seed)
        self._i = 0

    def __call__(self):
        k = jax.random.fold_in(self._root, self._i)
        self._i += 1
        return k


def _bn_affine(kg, cout, coutp):
    scale = jnp.pad(jnp.full((cout,), _BN_GAMMA, jnp.float32), (0, coutp - cout))
    bias = jnp.pad(0.01 * jax.random.normal(kg(), (cout,), jnp.float32),
                   (0, coutp - cout))
    return scale, bias


def _conv1x1_p(kg, cin, cout):
    cinp, coutp = _pad128(cin), _pad128(cout)
    w = jax.random.normal(kg(), (cin, cout), jnp.float32) * math.sqrt(2.0 / cin)
    w = jnp.pad(w, ((0, cinp - cin), (0, coutp - cout))).astype(jnp.bfloat16)
    scale, bias = _bn_affine(kg, cout, coutp)
    return {"w": w, "scale": scale, "bias": bias}


def _conv3x3_p(kg, cin, cout, pad_cin=True):
    cinp = _pad128(cin) if pad_cin else cin
    coutp = _pad128(cout)
    w = jax.random.normal(kg(), (9, cin, cout), jnp.float32) \
        * math.sqrt(2.0 / (9 * cin))
    w = jnp.pad(w, ((0, 0), (0, cinp - cin), (0, coutp - cout))).astype(jnp.bfloat16)
    scale, bias = _bn_affine(kg, cout, coutp)
    return {"w": w, "scale": scale, "bias": bias}


def _dw_p(kg, c):
    cp = _pad128(c)
    w = jax.random.normal(kg(), (9, c), jnp.float32) * math.sqrt(2.0 / 9.0)
    w = jnp.pad(w, ((0, 0), (0, cp - c)))
    scale, bias = _bn_affine(kg, c, cp)
    return {"w": w, "scale": scale, "bias": bias}


def _se_p(kg, c_exp, c_sq):
    cep, csp = _pad128(c_exp), _pad128(c_sq)
    w1 = jax.random.normal(kg(), (c_exp, c_sq), jnp.float32) * math.sqrt(2.0 / c_exp)
    w2 = jax.random.normal(kg(), (c_sq, c_exp), jnp.float32) * math.sqrt(2.0 / c_sq)
    return {"w1": jnp.pad(w1, ((0, cep - c_exp), (0, csp - c_sq))).astype(jnp.bfloat16),
            "b1": jnp.zeros((csp,), jnp.float32),
            "w2": jnp.pad(w2, ((0, csp - c_sq), (0, cep - c_exp))).astype(jnp.bfloat16),
            "b2": jnp.zeros((cep,), jnp.float32)}


def build_params(seed=1234):
    kg = _KeyGen(seed)
    params = {"stem": _conv3x3_p(kg, 3, 32, pad_cin=False)}
    blocks = []
    for (btype, e, _k, s, cin, cout, n) in V2_L_CONFIG:
        for li in range(n):
            b_in = cin if li == 0 else cout
            b_stride = s if li == 0 else 1
            exp_c = b_in * e
            bp = {"type": btype, "stride": b_stride,
                  "res": (b_stride == 1 and b_in == cout)}
            if btype == "fused":
                if e != 1:
                    bp["expand"] = _conv3x3_p(kg, b_in, exp_c)
                    bp["project"] = _conv1x1_p(kg, exp_c, cout)
                else:
                    bp["conv"] = _conv3x3_p(kg, b_in, cout)
            else:
                sq = max(1, b_in // 4)
                bp["expand"] = _conv1x1_p(kg, b_in, exp_c)
                bp["dw"] = _dw_p(kg, exp_c)
                bp["se"] = _se_p(kg, exp_c, sq)
                bp["project"] = _conv1x1_p(kg, exp_c, cout)
            blocks.append(bp)
    params["blocks"] = blocks
    params["head"] = _conv1x1_p(kg, 640, 1280)
    fcw = jax.random.normal(kg(), (1280, 1000), jnp.float32) * math.sqrt(1.0 / 1280.0)
    params["fc_w"] = jnp.pad(fcw, ((0, 0), (0, 24))).astype(jnp.bfloat16)
    params["fc_b"] = jnp.zeros((1024,), jnp.float32)
    params["fc_scale"] = jnp.ones((1024,), jnp.float32)
    return params


# ---------------------------------------------------------------------------
# Forward pass
# ---------------------------------------------------------------------------

def _fused_block(x, bp):
    inp = x
    s = bp["stride"]
    if "conv" in bp:                                       # expand_ratio == 1
        if s == 1:
            return conv3x3_s1(x, bp["conv"],
                              res=inp if bp["res"] else None, act="silu")
        return conv3x3_im2col(x, bp["conv"], stride=s, act="silu")
    # expand 3x3 (SiLU) + project 1x1 (linear, residual fused in epilogue)
    if s == 1:
        y = conv3x3_s1(x, bp["expand"], act="silu")
    else:
        y = conv3x3_im2col(x, bp["expand"], stride=s, act="silu")
    N, Ho, Wo, Ce = y.shape
    a = y.reshape(N * Ho * Wo, Ce)
    res = inp.reshape(N * Ho * Wo, inp.shape[-1]) if bp["res"] else None
    out = matmul_fused(a, bp["project"]["w"], bp["project"]["scale"],
                       bp["project"]["bias"], res=res, act="linear")
    return out.reshape(N, Ho, Wo, out.shape[-1])


def _mb_block(x, bp):
    inp = x
    N, H, W, Cp = x.shape
    # 1x1 expand + BN + SiLU
    a = x.reshape(N * H * W, Cp)
    y = matmul_fused(a, bp["expand"]["w"], bp["expand"]["scale"],
                     bp["expand"]["bias"], act="silu")
    Ce = y.shape[-1]
    y = y.reshape(N, H, W, Ce)
    # depthwise 3x3 + BN + SiLU
    y = dwconv_s1(y, bp["dw"]) if bp["stride"] == 1 else dwconv_s2(y, bp["dw"])
    _, Ho, Wo, _ = y.shape
    y3 = y.reshape(N, Ho * Wo, Ce)
    # Squeeze-Excitation: pool + both FC layers fused in one Pallas kernel
    gate = se_gates(y3, bp["se"])                          # (N, 1, Ce) f32
    # 1x1 project with SE channel gate + residual add fused into the matmul epilogue
    res3 = inp.reshape(N, Ho * Wo, inp.shape[-1]) if bp["res"] else None
    out3 = project_se_matmul(y3, gate, bp["project"]["w"], bp["project"]["scale"],
                             bp["project"]["bias"], res3)
    return out3.reshape(N, Ho, Wo, out3.shape[-1])


def encoder_forward(params, x_nchw):
    """tanh(efficientnet_v2_l(x)) — input NCHW (PyTorch convention), output (N, 1000)."""
    x = jnp.transpose(x_nchw.astype(jnp.float32), (0, 2, 3, 1)).astype(jnp.bfloat16)
    x = conv3x3_im2col(x, params["stem"], stride=2, act="silu")
    for bp in params["blocks"]:
        x = _fused_block(x, bp) if bp["type"] == "fused" else _mb_block(x, bp)
    # head 1x1 conv + BN + SiLU
    N, H, W, C = x.shape
    h = matmul_fused(x.reshape(N * H * W, C), params["head"]["w"],
                     params["head"]["scale"], params["head"]["bias"], act="silu")
    Ch = h.shape[-1]
    pooled = global_avgpool(h.reshape(N, H * W, Ch))       # adaptive avg pool -> (N, 1280)
    # Dropout(0.4) is identity in eval mode.
    logits = matmul_fused(pooled.astype(jnp.bfloat16), params["fc_w"],
                          params["fc_scale"], params["fc_b"],
                          act="tanh", out_dtype=jnp.float32)   # linear + final tanh fused
    return logits[:, :1000]


# ---------------------------------------------------------------------------

if __name__ == "__main__":
    params = build_params(seed=1234)
    x = jax.random.normal(jax.random.PRNGKey(0), (2, 3, 32, 32), jnp.float32)
    out = encoder_forward(params, x)
    out = jax.block_until_ready(out)
    assert out.shape == (2, 1000), out.shape
    assert out.dtype == jnp.float32
    assert bool(jnp.all(jnp.isfinite(out)))
    assert bool(jnp.all(jnp.abs(out) <= 1.0))   # tanh output range
    print("KERNEL_OK")
</pallas_src>

<mosaic_0001>
module attributes {stable_mosaic.version = 11 : i64} {
  func.func @_mm_kernel(%arg0: i32, %arg1: i32, %arg2: i32, %arg3: memref<256x128xbf16, #tpu.memory_space<vmem>>, %arg4: memref<128x128xbf16, #tpu.memory_space<vmem>>, %arg5: memref<1x128xf32, #tpu.memory_space<vmem>>, %arg6: memref<1x128xf32, #tpu.memory_space<vmem>>, %arg7: memref<256x128xbf16, #tpu.memory_space<vmem>>, %arg8: memref<256x128xf32, #tpu.memory_space<vmem>>) attributes {dimension_semantics = [#tpu.dimension_semantics<parallel>, #tpu.dimension_semantics<parallel>, #tpu.dimension_semantics<arbitrary>], iteration_bounds = array<i64: 2, 1, 1>, scalar_prefetch = 0 : i64, scratch_operands = 1 : i64, tpu.core_type = #tpu.core_type<tc>, window_params = [{transform_indices = @transform_0, window_bounds = array<i64: 256, 128>}, {transform_indices = @transform_1, window_bounds = array<i64: 128, 128>}, {transform_indices = @transform_2, window_bounds = array<i64: 1, 128>}, {transform_indices = @transform_3, window_bounds = array<i64: 1, 128>}, {transform_indices = @transform_4, window_bounds = array<i64: 256, 128>}]} {
    %c0_i32 = arith.constant 0 : i32
    %0 = arith.cmpi eq, %arg2, %c0_i32 : i32
    %1 = arith.extui %0 : i1 to i32
    %c0_i32_0 = arith.constant 0 : i32
    %2 = arith.cmpi ne, %1, %c0_i32_0 : i32
    scf.if %2 {
      %cst_10 = arith.constant 0.000000e+00 : f32
      %12 = vector.broadcast %cst_10 : f32 to vector<256x128xf32>
      %c0_11 = arith.constant 0 : index
      %c0_12 = arith.constant 0 : index
      %13 = vector.load %arg8[%c0_11, %c0_12] : memref<256x128xf32, #tpu.memory_space<vmem>>, vector<256x128xf32>
      tpu.vector_store %arg8[%c0_11, %c0_12], %12 {strides = array<i32>} : memref<256x128xf32, #tpu.memory_space<vmem>>, vector<256x128xf32>,
    } else {
    }
    %c0 = arith.constant 0 : index
    %c0_1 = arith.constant 0 : index
    %3 = vector.load %arg8[%c0, %c0_1] : memref<256x128xf32, #tpu.memory_space<vmem>>, vector<256x128xf32>
    %c0_2 = arith.constant 0 : index
    %c0_3 = arith.constant 0 : index
    %4 = vector.load %arg3[%c0_2, %c0_3] : memref<256x128xbf16, #tpu.memory_space<vmem>>, vector<256x128xbf16>
    %c0_4 = arith.constant 0 : index
    %c0_5 = arith.constant 0 : index
    %5 = vector.load %arg4[%c0_4, %c0_5] : memref<128x128xbf16, #tpu.memory_space<vmem>>, vector<128x128xbf16>
    %cst = arith.constant dense<0.000000e+00> : vector<256x128xf32>
    %6 = tpu.matmul %4, %5, %cst {dimension_numbers = #tpu.dot_dimension_numbers<[1], [0], [0], [1], [0, 0, 1, 1], [], []>} : vector<256x128xbf16>, vector<128x128xbf16>, vector<256x128xf32> -> vector<256x128xf32>
    %7 = arith.addf %3, %6 : vector<256x128xf32>
    %c0_6 = arith.constant 0 : index
    %c0_7 = arith.constant 0 : index
    %8 = vector.load %arg8[%c0_6, %c0_7] : memref<256x128xf32, #tpu.memory_space<vmem>>, vector<256x128xf32>
    tpu.vector_store %arg8[%c0_6, %c0_7], %7 {strides = array<i32>} : memref<256x128xf32, #tpu.memory_space<vmem>>, vector<256x128xf32>,
    %c0_i32_8 = arith.constant 0 : i32
    %9 = arith.cmpi eq, %arg2, %c0_i32_8 : i32
    %10 = arith.extui %9 : i1 to i32
    %c0_i32_9 = arith.constant 0 : i32
    %11 = arith.cmpi ne, %10, %c0_i32_9 : i32
    scf.if %11 {
      %c0_10 = arith.constant 0 : index
      %c0_11 = arith.constant 0 : index
      %12 = vector.load %arg8[%c0_10, %c0_11] : memref<256x128xf32, #tpu.memory_space<vmem>>, vector<256x128xf32>
      %c0_12 = arith.constant 0 : index
      %c0_13 = arith.constant 0 : index
      %13 = vector.load %arg5[%c0_12, %c0_13] : memref<1x128xf32, #tpu.memory_space<vmem>>, vector<1x128xf32>
      %14 = vector.broadcast %13 : vector<1x128xf32> to vector<256x128xf32>
      %15 = arith.mulf %12, %14 : vector<256x128xf32>
      %c0_14 = arith.constant 0 : index
      %c0_15 = arith.constant 0 : index
      %16 = vector.load %arg6[%c0_14, %c0_15] : memref<1x128xf32, #tpu.memory_space<vmem>>, vector<1x128xf32>
      %17 = vector.broadcast %16 : vector<1x128xf32> to vector<256x128xf32>
      %18 = arith.addf %15, %17 : vector<256x128xf32>
      %cst_16 = arith.constant -3.000000e+01 : f32
      %19 = vector.broadcast %cst_16 : f32 to vector<256x128xf32>
      %20 = arith.maximumf %18, %19 : vector<256x128xf32>
      %cst_17 = arith.constant 0.000000e+00 : f32
      %21 = vector.broadcast %cst_17 : f32 to vector<256x128xf32>
      %22 = arith.subf %21, %20 : vector<256x128xf32>
      %23 = math.exp %22 : vector<256x128xf32>
      %cst_18 = arith.constant 1.000000e+00 : f32
      %24 = vector.broadcast %cst_18 : f32 to vector<256x128xf32>
      %25 = arith.addf %24, %23 : vector<256x128xf32>
      %26 = tpu.reciprocal %25 {approx = true} : vector<256x128xf32> -> vector<256x128xf32>
      %27 = arith.mulf %18, %26 : vector<256x128xf32>
      %28 = arith.truncf %27 : vector<256x128xf32> to vector<256x128xbf16>
      %c0_19 = arith.constant 0 : index
      %c0_20 = arith.constant 0 : index
      %29 = vector.load %arg7[%c0_19, %c0_20] : memref<256x128xbf16, #tpu.memory_space<vmem>>, vector<256x128xbf16>
      tpu.vector_store %arg7[%c0_19, %c0_20], %28 {strides = array<i32>} : memref<256x128xbf16, #tpu.memory_space<vmem>>, vector<256x128xbf16>,
    } else {
    }
    return
  }
  func.func @transform_0(%arg0: i32, %arg1: i32, %arg2: i32) -> (i32, i32) {
    %c0_i32 = arith.constant 0 : i32
    return %arg0, %arg2 : i32, i32
  }
  func.func @transform_1(%arg0: i32, %arg1: i32, %arg2: i32) -> (i32, i32) {
    %c0_i32 = arith.constant 0 : i32
    return %arg2, %arg1 : i32, i32
  }
  func.func @transform_2(%arg0: i32, %arg1: i32, %arg2: i32) -> (i32, i32) {
    %c0_i32 = arith.constant 0 : i32
    %c0_i32_0 = arith.constant 0 : i32
    return %c0_i32, %arg1 : i32, i32
  }
  func.func @transform_3(%arg0: i32, %arg1: i32, %arg2: i32) -> (i32, i32) {
    %c0_i32 = arith.constant 0 : i32
    %c0_i32_0 = arith.constant 0 : i32
    return %c0_i32, %arg1 : i32, i32
  }
  func.func @transform_4(%arg0: i32, %arg1: i32, %arg2: i32) -> (i32, i32) {
    %c0_i32 = arith.constant 0 : i32
    return %arg0, %arg1 : i32, i32
  }
}

</mosaic_0001>

<bundles_post_ra>
// kernel: matmul_fused.1
= control target key start
LH: loop header
LB: loop body
LE: loop exit
PB: predicated region body
PF: predicated region fallthrough
CT: control target
= control target key end

     0   :  { %9 = vsyncpa [#allocation4], 0  ;;  %s2440_s0 = inlined_call_operand.vmem [shape: bf16[512,128], index: 0, kind: input, shape index: {}]   ;;  %s2441_s1 = inlined_call_operand.vmem [shape: bf16[128,128], index: 1, kind: input, shape index: {}]   ;;  %s2442_s2 = inlined_call_operand.vmem [shape: f32[1,128], index: 2, kind: input, shape index: {}]   ;;  %s2443_s3 = inlined_call_operand.vmem [shape: f32[1,128], index: 3, kind: input, shape index: {}]   ;;  %s2444_s4 = inlined_call_operand.hbm [shape: bf16[512,128], index: 4, kind: output, shape index: {}]  }
   0x1   :  { %11 = vsyncpa [#allocation4 + $0x1], 0  ;;  %s2017_s15 = smov 0   ;;  %s2019_s16 = smov 0  }
   0x2   :  { %s2021_s17 = smov 0   ;;  %s2023_s18 = smov 0  }
   0x3   :  { %s2025_s19 = smov 0   ;;  %s2027_s20 = smov 0  }
   0x4 LB: > { %s1410_s21 = sadd.s32 4294967295, %s1987_s20   ;;  %s1411_s22 = sadd.s32 4294967294, %s1987_s20   ;;  %s1987_s20 = sphi %s2027_s20, %s17_s20   ;;  %s1983_s19 = sphi %s2025_s19, %s2451_s19   ;;  %s1979_s18 = sphi %s2023_s18, %s2450_s18   ;;  %s1975_s17 = sphi %s2021_s17, %s2449_s17   ;;  %s1971_s16 = sphi %s2019_s16, %s2448_s16   ;;  %s1967_s15 = sphi %s2017_s15, %s2447_s15  }
   0x5   : > { %s36_s23 = sadd.s32 1, %s1983_s19  ;;  %s153_s24 = sadd.s32 1, %s1975_s17 }
   0x6   : > { %p38_p0 = scmp.ge.s32.totalorder %s36_s23, 2  ;;  %p163_p1 = scmp.ne.s32.totalorder %s1975_s17, %s1971_s16 }
   0x7   : > { %p164_p2 = scmp.eq.s32.totalorder %s1410_s21, 1  ;;  %p169_p3 = scmp.ne.s32.totalorder %s1971_s16, %s1967_s15 }
   0x8   : > { %s2453_s23 = smov (%p38_p0, %s36_s23), 0  ;;  %p170_p5 = scmp.eq.s32.totalorder %s1411_s22, 1 }
   0x9   : > { %p2057_p4 = por %p164_p2, %p163_p1  ;;  %s148_s26 = ssub.s32 %s1983_s19, %s2453_s23 }
   0xa   : > { %p1417_p6 = scmp.ge.s32.totalorder %s1987_s20, 1  ;;  %p151_p7 = scmp.eq.s32.totalorder %s148_s26, 0 }
   0xb   : > { %p2064_p8 = por %p170_p5, %p169_p3  ;;  %p224_p9 = scmp.lt.s32.totalorder %s1987_s20, 3 }
   0xc   : > { %s2070_s28 = scalar_select %p151_p7, %s1975_s17, %s153_s24  }
   0xd   : > { %p225_p10 = pnand %p1417_p6, %p224_p9 }
   0xe   : > { %v1757_v0 = vld [vmem:[%s2441_s1] sm:$0xff] (!%p225_p10)   ;;  %s1419_s5 = sshll.u32 (!%p225_p10), %s1979_s18, 5  ;;  %v1758_v1 = vld [vmem:[%s2441_s1 + $0x8] sm:$0xff] (!%p225_p10)   ;;  %v1759_v2 = vld [vmem:[%s2441_s1 + $0x10] sm:$0xff] (!%p225_p10)   ;;  %s264_s12 = sand.u32 (!%p225_p10), 1, %s1971_s16  }
   0xf   : > { %228 = sbr.rel (%p225_p10) target bundleno = 375 (0x177), region = 36  ;;  %p268_p11 = scmp.lt.s32.totalorder (!%p225_p10), %s1419_s5, 63  ;;  %1636 = vmatprep.subr.bf16.mxu0 (!%p225_p10), %v1757_v0  ;;  %1684 = vmatprep.subr.bf16.mxu1 (!%p225_p10), %v1757_v0  ;;  %v1760_v3 = vld [vmem:[%s2441_s1 + $0x18] sm:$0xff] (!%p225_p10)   ;;  %v1761_v6 = vld [vmem:[%s2441_s1 + $0x20] sm:$0xff] (!%p225_p10)   ;;  %v1762_v7 = vld [vmem:[%s2441_s1 + $0x28] sm:$0xff] (!%p225_p10)  }
  0x10   : > { %1637 = vmatpush3.bf16.msra.mxu0 (!%p225_p10), %v1757_v0  ;;  %1692 = vmatpush3.bf16.msra.mxu1 (!%p225_p10), %v1757_v0  ;;  %v1763_v8 = vld [vmem:[%s2441_s1 + $0x30] sm:$0xff] (!%p225_p10)   ;;  %v1764_v9 = vld [vmem:[%s2441_s1 + $0x38] sm:$0xff] (!%p225_p10)   ;;  %v2121_v24 = vld [vmem:[%s2442_s2] ss:$0 sm:$0xff] (!%p225_p10)  ;;  %s1516_s21 = sshll.u32 (!%p225_p10), %s1979_s18, 11  ;;  %s2394_s18 = scalar_lea.sflag (!%p225_p10), [#allocation4], %s264_s12 }
  0x11   : > { %1638 = vmatprep.subr.bf16.mxu0 (!%p225_p10), %v1758_v1  ;;  %1685 = vmatprep.subr.bf16.mxu1 (!%p225_p10), %v1758_v1  ;;  %v2126_v26 = vld [vmem:[%s2443_s3] ss:$0 sm:$0xff] (!%p225_p10)  ;;  %s2386_s29 = scalar_lea.hbm (!%p225_p10), %s2444_s4, %s1516_s21 }
  0x14   : > { %1639 = vmatpush3.bf16.msra.mxu0 (!%p225_p10), %v1758_v1  ;;  %1693 = vmatpush3.bf16.msra.mxu1 (!%p225_p10), %v1758_v1 }
  0x15   : > { %1640 = vmatprep.subr.bf16.mxu0 (!%p225_p10), %v1759_v2  ;;  %1686 = vmatprep.subr.bf16.mxu1 (!%p225_p10), %v1759_v2 }
  0x16   : > { %s2455_s5 = smov (!%p268_p11, %s1419_s5), 63 }
  0x17   : > { %s1420_s10 = sshll.u32 %s2455_s5, 2  ;;  %s1989_s5 = smov [#allocation3]  }
  0x18   : > { %s2085_s13 = scalar_lea.vmem %s2440_s0, %s1420_s10  ;;  %1641 = vmatpush3.bf16.msra.mxu0 %v1759_v2  ;;  %1694 = vmatpush3.bf16.msra.mxu1 %v1759_v2  ;;  %s1913_s6 = sshll.u32 %s1989_s5, 4  ;;  %s1914_s6 = int_to_ptr.vmem [resolvable:$false] %s1913_s6 }
  0x19   : > { %v1765_v4 = vld [vmem:[%s2085_s13] sm:$0xff]   ;;  %1642 = vmatprep.subr.bf16.mxu0 %v1760_v3  ;;  %1687 = vmatprep.subr.bf16.mxu1 %v1760_v3  ;;  %v1767_v10 = vld [vmem:[%s2085_s13 + $0x8] sm:$0xff]   ;;  %v1769_v12 = vld [vmem:[%s2085_s13 + $0x10] sm:$0xff]   ;;  %s1915_s7 = scalar_lea.vmem %s1914_s6, 4096 }
  0x1a   : > { %v1766_v5 = vld [vmem:[%s2085_s13 + $0x40] sm:$0xff]   ;;  %1652 = vmatprep.mubr.bf16.mxu0 %v1765_v4  ;;  %v1768_v11 = vld [vmem:[%s2085_s13 + $0x48] sm:$0xff]   ;;  %v1770_v13 = vld [vmem:[%s2085_s13 + $0x50] sm:$0xff]  }
  0x1b   : > { %1668 = vmatprep.mubr.bf16.mxu1 %v1766_v5  ;;  %v1771_v14 = vld [vmem:[%s2085_s13 + $0x18] sm:$0xff]   ;;  %v1773_v16 = vld [vmem:[%s2085_s13 + $0x20] sm:$0xff]   ;;  %v1775_v18 = vld [vmem:[%s2085_s13 + $0x28] sm:$0xff]  }
  0x1c   : > { %1643 = vmatpush3.bf16.msra.mxu0 %v1760_v3  ;;  %1695 = vmatpush3.bf16.msra.mxu1 %v1760_v3  ;;  %v1772_v15 = vld [vmem:[%s2085_s13 + $0x58] sm:$0xff]   ;;  %v1774_v17 = vld [vmem:[%s2085_s13 + $0x60] sm:$0xff]   ;;  %v1776_v19 = vld [vmem:[%s2085_s13 + $0x68] sm:$0xff]  }
  0x1d   : > { %1644 = vmatprep.subr.bf16.mxu0 %v1761_v6  ;;  %1688 = vmatprep.subr.bf16.mxu1 %v1761_v6  ;;  %v1777_v20 = vld [vmem:[%s2085_s13 + $0x30] sm:$0xff]   ;;  %v1779_v22 = vld [vmem:[%s2085_s13 + $0x38] sm:$0xff]  }
  0x1e   : > { %v1778_v21 = vld [vmem:[%s2085_s13 + $0x70] sm:$0xff]   ;;  %v1780_v23 = vld [vmem:[%s2085_s13 + $0x78] sm:$0xff]   ;;  %s1418_s13 = sshll.u32 %s264_s12, 7 }
  0x1f   : > { %s2288_s14 = scalar_lea.vmem [#allocation3], %s1418_s13 }
  0x20   : > { %1645 = vmatpush3.bf16.msra.mxu0 %v1761_v6  ;;  %1696 = vmatpush3.bf16.msra.mxu1 %v1761_v6  ;;  %s1290_s22 = sshll.u32 %s2288_s14, 4  ;;  %s2388_s22 = int_to_ptr.vmem [resolvable:$true] %s1290_s22 }
  0x21   : > { %1646 = vmatprep.subr.bf16.mxu0 %v1762_v7  ;;  %1689 = vmatprep.subr.bf16.mxu1 %v1762_v7  ;;  %s1909_s30 = scalar_lea.vmem %s2388_s22, 2048  ;;  %p1916_p1 = scmp.lt.s32.totalorder %s2388_s22, %s1914_s6 }
  0x22   : > { %p1910_p12 = scmp.ne.s32.totalorder %s2388_s22, %s1909_s30  ;;  %p1917_p2 = scmp.lt.s32.totalorder %s1915_s7, %s1909_s30 }
  0x24   : > { %1647 = vmatpush3.bf16.msra.mxu0 %v1762_v7  ;;  %1697 = vmatpush3.bf16.msra.mxu1 %v1762_v7  ;;  %p1911_p13 = pnand %p1910_p12, %p2057_p4  ;;  %p1918_p3 = por %p1917_p2, %p1916_p1 }
  0x25   : > { %1648 = vmatprep.subr.bf16.mxu0 %v1763_v8  ;;  %1690 = vmatprep.subr.bf16.mxu1 %v1763_v8 }
  0x26   : > { %p1912_p0 = pneg %p1911_p13 }
  0x28   : > { %1649 = vmatpush3.bf16.msra.mxu0 %v1763_v8  ;;  %1698 = vmatpush3.bf16.msra.mxu1 %v1763_v8  ;;  %p1919_p5 = pnand %p1918_p3, %p1912_p0 }
  0x29   : > { %1650 = vmatprep.subr.bf16.mxu0 %v1764_v9  ;;  %1691 = vmatprep.subr.bf16.mxu1 %v1764_v9 }
  0x2c   : > { %1651 = vmatpush3.bf16.msra.mxu0 %v1764_v9  ;;  %1699 = vmatpush3.bf16.msra.mxu1 %v1764_v9 }
  0x2f   : > { %1653 = vmatmul.mubr.bf16.vlgmr.msra.gmra.mrb[0].mxu0 %v1767_v10  ;;  %1669 = vmatmul.mubr.bf16.vlgmr.msra.gmra.mrb[0].mxu1 %v1768_v11 }
  0x30   : > { %1656 = vmatprep.mubr.bf16.mxu0 %v1769_v12  ;;  %1672 = vmatprep.mubr.bf16.mxu1 %v1770_v13 }
  0x37   : > { %1657 = vmatmul.mubr.bf16.gmra.mrb[4].mxu0 %v1771_v14  ;;  %1673 = vmatmul.mubr.bf16.gmra.mrb[4].mxu1 %v1772_v15 }
  0x38   : > { %1660 = vmatprep.mubr.bf16.mxu0 %v1773_v16  ;;  %1676 = vmatprep.mubr.bf16.mxu1 %v1774_v17 }
  0x3f   : > { %1661 = vmatmul.mubr.bf16.gmra.mrb[8].mxu0 %v1775_v18  ;;  %1677 = vmatmul.mubr.bf16.gmra.mrb[8].mxu1 %v1776_v19 }
  0x40   : > { %1664 = vmatprep.mubr.bf16.mxu0 %v1777_v20  ;;  %1680 = vmatprep.mubr.bf16.mxu1 %v1778_v21 }
  0x47   : > { %1665 = vmatmul.mubr.bf16.gmra.mrb[12].mxu0 %v1779_v22  ;;  %1681 = vmatmul.mubr.bf16.gmra.mrb[12].mxu1 %v1780_v23 }
 0x102   : > { %v1654_v25 = vpop.f32.mrb[0].mxu0  ;;  %v1670_v27 = vpop.f32.mrb[0].mxu1 }
 0x103   : > { %v822_v28 = vmul.f32 %v1654_v25, %v2121_v24  ;;  %v838_v29 = vmul.f32 %v1670_v27, %v2121_v24  ;;  %v587_v30 = vpop.f32.mrb[1].mxu0  ;;  %v651_v31 = vpop.f32.mrb[1].mxu1 }
 0x104   : > { %v820_v32 = vmul.f32 %v2121_v24, %v587_v30  ;;  %v836_v33 = vmul.f32 %v2121_v24, %v651_v31  ;;  %v1655_v34 = vpop.f32.mrb[2].mxu0  ;;  %v1671_v35 = vpop.f32.mrb[2].mxu1 }
 0x105   : > { %v2133_v36 = vadd.f32 %v2126_v26, %v822_v28  ;;  %v2136_v37 = vadd.f32 %v2126_v26, %v838_v29  ;;  %v823_v38 = vmul.f32 %v1655_v34, %v2121_v24  ;;  %v839_v39 = vmul.f32 %v1671_v35, %v2121_v24  ;;  %v590_v40 = vpop.f32.mrb[3].mxu0  ;;  %v654_v41 = vpop.f32.mrb[3].mxu1 }
 0x106   : > { %v2141_v42 = vadd.f32 %v2126_v26, %v820_v32  ;;  %v2144_v43 = vadd.f32 %v2126_v26, %v836_v33  ;;  %v821_v44 = vmul.f32 %v2121_v24, %v590_v40  ;;  %v837_v45 = vmul.f32 %v2121_v24, %v654_v41 }
 0x107   : > { %v893_v46 = vmax.f32 %v2133_v36, -30.0  ;;  %v909_v47 = vmax.f32 %v2136_v37, -30.0  ;;  %v2151_v48 = vadd.f32 %v2126_v26, %v823_v38  ;;  %v2154_v49 = vadd.f32 %v2126_v26, %v839_v39 }
 0x108   : > { %v891_v50 = vmax.f32 %v2141_v42, -30.0  ;;  %v907_v51 = vmax.f32 %v2144_v43, -30.0  ;;  %v2159_v52 = vadd.f32 %v2126_v26, %v821_v44  ;;  %v2162_v53 = vadd.f32 %v2126_v26, %v837_v45 }
 0x109   : > { %v925_v54 = vsub.f32 0.0, %v893_v46  ;;  %v941_v55 = vsub.f32 0.0, %v909_v47  ;;  %v894_v56 = vmax.f32 %v2151_v48, -30.0  ;;  %v910_v57 = vmax.f32 %v2154_v49, -30.0 }
 0x10a   : > { %v923_v58 = vsub.f32 0.0, %v891_v50  ;;  %v939_v59 = vsub.f32 0.0, %v907_v51  ;;  %v892_v60 = vmax.f32 %v2159_v52, -30.0  ;;  %v908_v61 = vmax.f32 %v2162_v53, -30.0  ;;  %v1658_v62 = vpop.f32.mrb[4].mxu0  ;;  %v1674_v63 = vpop.f32.mrb[4].mxu1 }
 0x10b   : > { %v959_v0 = vmul.f32 1.442695, %v925_v54  ;;  %v991_v1 = vmul.f32 1.442695, %v941_v55  ;;  %v926_v2 = vsub.f32 0.0, %v894_v56  ;;  %v942_v3 = vsub.f32 0.0, %v910_v57 }
 0x10c   : > { %v955_v4 = vmul.f32 1.442695, %v923_v58  ;;  %v987_v5 = vmul.f32 1.442695, %v939_v59  ;;  %v924_v6 = vsub.f32 0.0, %v892_v60  ;;  %v940_v7 = vsub.f32 0.0, %v908_v61 }
 0x10d   : > { %1781 = vpow2.f32 %v959_v0  ;;  %v961_v8 = vmul.f32 1.442695, %v926_v2  ;;  %v993_v9 = vmul.f32 1.442695, %v942_v3  ;;  %v826_v10 = vmul.f32 %v1658_v62, %v2121_v24  ;;  %v603_v11 = vpop.f32.mrb[5].mxu0  ;;  %v667_v12 = vpop.f32.mrb[5].mxu1 }
 0x10e   : > { %1783 = vpow2.f32 %v991_v1  ;;  %v957_v13 = vmul.f32 1.442695, %v924_v6  ;;  %v989_v14 = vmul.f32 1.442695, %v940_v7  ;;  %v842_v15 = vmul.f32 %v1674_v63, %v2121_v24  ;;  %v1659_v16 = vpop.f32.mrb[6].mxu0  ;;  %v1675_v17 = vpop.f32.mrb[6].mxu1 }
 0x10f   : > { %1785 = vpow2.f32 %v955_v4  ;;  %v2171_v18 = vadd.f32 %v2126_v26, %v826_v10  ;;  %v824_v19 = vmul.f32 %v2121_v24, %v603_v11  ;;  %v840_v20 = vmul.f32 %v2121_v24, %v667_v12  ;;  %v606_v21 = vpop.f32.mrb[7].mxu0  ;;  %v670_v22 = vpop.f32.mrb[7].mxu1 }
 0x110   : > { %1787 = vpow2.f32 %v987_v5  ;;  %v2176_v23 = vadd.f32 %v2126_v26, %v842_v15  ;;  %v827_v25 = vmul.f32 %v1659_v16, %v2121_v24  ;;  %v843_v27 = vmul.f32 %v1675_v17, %v2121_v24 }
 0x111   : > { %1789 = vpow2.f32 %v961_v8  ;;  %v897_v28 = vmax.f32 %v2171_v18, -30.0  ;;  %v2182_v29 = vadd.f32 %v2126_v26, %v824_v19  ;;  %v2185_v30 = vadd.f32 %v2126_v26, %v840_v20 }
 0x112   : > { %1791 = vpow2.f32 %v993_v9  ;;  %v913_v31 = vmax.f32 %v2176_v23, -30.0  ;;  %v2189_v32 = vadd.f32 %v2126_v26, %v827_v25  ;;  %v2192_v33 = vadd.f32 %v2126_v26, %v843_v27  ;;  %v1662_v34 = vpop.f32.mrb[8].mxu0  ;;  %v1678_v35 = vpop.f32.mrb[8].mxu1 }
 0x113   : > { %1793 = vpow2.f32 %v957_v13  ;;  %v929_v38 = vsub.f32 0.0, %v897_v28  ;;  %v895_v39 = vmax.f32 %v2182_v29, -30.0  ;;  %v911_v40 = vmax.f32 %v2185_v30, -30.0  ;;  %v2196_v41 = vpop.f32.mrb[9].mxu0  ;;  %v2198_v44 = vpop.f32.mrb[9].mxu1 }
 0x114   : > { %1795 = vpow2.f32 %v989_v14  ;;  %v945_v45 = vsub.f32 0.0, %v913_v31  ;;  %v898_v46 = vmax.f32 %v2189_v32, -30.0  ;;  %v914_v47 = vmax.f32 %v2192_v33, -30.0  ;;  %v2202_v50 = vpop.f32.mrb[10].mxu0  ;;  %v2204_v51 = vpop.f32.mrb[10].mxu1 }
 0x115   : > { %v967_v54 = vmul.f32 1.442695, %v929_v38  ;;  %v927_v55 = vsub.f32 0.0, %v895_v39  ;;  %v943_v56 = vsub.f32 0.0, %v911_v40  ;;  %v825_v57 = vmul.f32 %v2121_v24, %v606_v21  ;;  %v2207_v58 = vpop.f32.mrb[11].mxu0  ;;  %v2209_v59 = vpop.f32.mrb[11].mxu1 }
 0x116   : > { %v999_v60 = vmul.f32 1.442695, %v945_v45  ;;  %v930_v61 = vsub.f32 0.0, %v898_v46  ;;  %v841_v62 = vmul.f32 %v2121_v24, %v670_v22  ;;  %v946_v1 = vsub.f32 0.0, %v914_v47 }
 0x117   : > { %v1782_v63 = vpop.eup %1781  ;;  %1797 = vpow2.f32 %v967_v54  ;;  %v963_v0 = vmul.f32 1.442695, %v927_v55  ;;  %v2213_v2 = vadd.f32 %v2126_v26, %v825_v57  ;;  %v995_v5 = vmul.f32 1.442695, %v943_v56 }
 0x118   : > { %v1784_v3 = vpop.eup %1783  ;;  %v1021_v4 = vadd.f32 1.0, %v1782_v63  ;;  %1799 = vpow2.f32 %v999_v60  ;;  %v969_v6 = vmul.f32 1.442695, %v930_v61  ;;  %v2217_v10 = vadd.f32 %v2126_v26, %v841_v62 }
 0x119   : > { %v1786_v7 = vpop.eup %1785  ;;  %v1037_v8 = vadd.f32 1.0, %v1784_v3  ;;  %1801 = vpow2.f32 %v963_v0  ;;  %v896_v9 = vmax.f32 %v2213_v2, -30.0  ;;  %v830_v13 = vmul.f32 %v1662_v34, %v2121_v24 }
 0x11a   : > { %v1788_v11 = vpop.eup %1787  ;;  %1803 = vrcp.f32 %v1021_v4  ;;  %v1019_v12 = vadd.f32 1.0, %v1786_v7  ;;  %v846_v14 = vmul.f32 %v1678_v35, %v2121_v24  ;;  %v2221_v15 = vpop.f32.mrb[12].mxu0  ;;  %v912_v21 = vmax.f32 %v2217_v10, -30.0 }
 0x11b   : > { %v2223_v16 = vpop.f32.mrb[12].mxu1  ;;  %v1790_v17 = vpop.eup %1789  ;;  %1805 = vrcp.f32 %v1037_v8  ;;  %v1035_v19 = vadd.f32 1.0, %v1788_v11  ;;  %v928_v20 = vsub.f32 0.0, %v896_v9  ;;  %v2231_v31 = vadd.f32 %v2126_v26, %v830_v13 }
 0x11c   : > { %v2226_v22 = vpop.f32.mrb[13].mxu0  ;;  %v2228_v25 = vpop.f32.mrb[13].mxu1  ;;  %1807 = vrcp.f32 %v1019_v12  ;;  %v1022_v28 = vadd.f32 1.0, %v1790_v17  ;;  %v2234_v34 = vadd.f32 %v2126_v26, %v846_v14  ;;  %v1001_v45 = vmul.f32 1.442695, %v946_v1 }
 0x11d   : > { %v1792_v27 = vpop.eup %1791  ;;  %v2236_v35 = vpop.f32.mrb[14].mxu0  ;;  %1809 = vrcp.f32 %v1035_v19  ;;  %v944_v46 = vsub.f32 0.0, %v912_v21  ;;  %v901_v57 = vmax.f32 %v2231_v31, -30.0  ;;  %v965_v62 = vmul.f32 1.442695, %v928_v20 }
 0x11e   : > { %v2238_v38 = vpop.f32.mrb[14].mxu1  ;;  %v1794_v39 = vpop.eup %1793  ;;  %v1038_v40 = vadd.f32 1.0, %v1792_v27  ;;  %1811 = vrcp.f32 %v1022_v28  ;;  %v917_v60 = vmax.f32 %v2234_v34, -30.0  ;;  %v828_v63 = vmul.f32 %v2121_v24, %v2196_v41 }
 0x11f   : > { %v2240_v47 = vpop.f32.mrb[15].mxu0  ;;  %v2242_v54 = vpop.f32.mrb[15].mxu1  ;;  %v1020_v56 = vadd.f32 1.0, %v1794_v39  ;;  %v933_v0 = vsub.f32 0.0, %v901_v57  ;;  %v844_v3 = vmul.f32 %v2121_v24, %v2198_v44  ;;  %v831_v8 = vmul.f32 %v2202_v50, %v2121_v24 }
 0x120   : > { %v1796_v55 = vpop.eup %1795  ;;  %1813 = vrcp.f32 %v1038_v40  ;;  %v949_v1 = vsub.f32 0.0, %v917_v60  ;;  %v2251_v7 = vadd.f32 %v2126_v26, %v828_v63  ;;  %v847_v9 = vmul.f32 %v2204_v51, %v2121_v24 }
 0x121   : > { %v1036_v61 = vadd.f32 1.0, %v1796_v55  ;;  %1815 = vrcp.f32 %v1020_v56  ;;  %v1798_v4 = vpop.eup %1797  ;;  %v997_v12 = vmul.f32 1.442695, %v944_v46  ;;  %v975_v13 = vmul.f32 1.442695, %v933_v0 }
 0x122   : > { %v1800_v11 = vpop.eup %1799  ;;  %v1025_v41 = vadd.f32 1.0, %v1798_v4  ;;  %v899_v44 = vmax.f32 %v2251_v7, -30.0  ;;  %v2259_v19 = vadd.f32 %v2126_v26, %v844_v3  ;;  %v2263_v51 = vadd.f32 %v2126_v26, %v831_v8 }
 0x123   : > { %1817 = vrcp.f32 %v1036_v61  ;;  %v1802_v14 = vpop.eup %1801  ;;  %v1041_v17 = vadd.f32 1.0, %v1800_v11  ;;  %v1007_v27 = vmul.f32 1.442695, %v949_v1 }
 0x124   : > { %1819 = vpow2.f32 %v995_v5  ;;  %v1804_v20 = vpop.eup %1803  ;;  %v1023_v50 = vadd.f32 1.0, %v1802_v14  ;;  %v2266_v5 = vadd.f32 %v2126_v26, %v847_v9  ;;  %v915_v28 = vmax.f32 %v2259_v19, -30.0 }
 0x125   : > { %1821 = vpow2.f32 %v969_v6  ;;  %v1806_v21 = vpop.eup %1805  ;;  %v931_v6 = vsub.f32 0.0, %v899_v44  ;;  %v1085_v40 = vmul.f32 %v1804_v20, %v2133_v36  ;;  %v902_v46 = vmax.f32 %v2263_v51, -30.0 }
 0x126   : > { %1823 = vrcp.f32 %v1025_v41  ;;  %v1808_v39 = vpop.eup %1807  ;;  %v918_v55 = vmax.f32 %v2266_v5, -30.0  ;;  %v1101_v57 = vmul.f32 %v1806_v21, %v2136_v37  ;;  %v947_v61 = vsub.f32 0.0, %v915_v28 }
 0x127   : > { %1825 = vrcp.f32 %v1041_v17  ;;  %v1810_v56 = vpop.eup %1809  ;;  %v1083_v60 = vmul.f32 %v1808_v39, %v2141_v42  ;;  %v971_v1 = vmul.f32 1.442695, %v931_v6  ;;  %v934_v36 = vsub.f32 0.0, %v902_v46 }
 0x128   : > { %1827 = vrcp.f32 %v1023_v50  ;;  %v1812_v63 = vpop.eup %1811  ;;  %v1099_v0 = vmul.f32 %v1810_v56, %v2144_v43  ;;  %v950_v8 = vsub.f32 0.0, %v918_v55  ;;  %v829_v37 = vmul.f32 %v2121_v24, %v2207_v58 }
 0x129   : > { %1829 = vpow2.f32 %v1001_v45  ;;  %v1086_v4 = vmul.f32 %v1812_v63, %v2151_v48  ;;  %v1003_v45 = vmul.f32 1.442695, %v947_v61  ;;  %v977_v11 = vmul.f32 1.442695, %v934_v36 }
 0x12a   : > { %1831 = vpow2.f32 %v965_v62  ;;  %v1814_v3 = vpop.eup %1813  ;;  %v2283_v62 = vadd.f32 %v2126_v26, %v829_v37  ;;  %v845_v58 = vmul.f32 %v2121_v24, %v2209_v59  ;;  %v1009_v44 = vmul.f32 1.442695, %v950_v8 }
 0x12b   : > { %1833 = vpow2.f32 %v997_v12  ;;  %v1816_v9 = vpop.eup %1815  ;;  %v1102_v42 = vmul.f32 %v1814_v3, %v2154_v49  ;;  %v1525_v14 = vpack.c.bf16 %v1086_v4, %v1085_v40  ;;  %v834_v28 = vmul.f32 %v2221_v15, %v2121_v24 }
 0x12c   : > { %1835 = vpow2.f32 %v975_v13  ;;  %v1084_v43 = vmul.f32 %v1816_v9, %v2159_v52  ;;  %v900_v20 = vmax.f32 %v2283_v62, -30.0  ;;  %v2294_v59 = vadd.f32 %v2126_v26, %v845_v58 }
 0x12d   : > { %v1818_v41 = vpop.eup %1817  ;;  %1837 = vpow2.f32 %v1007_v27  ;;  %v1565_v12 = vpack.c.bf16 %v1102_v42, %v1101_v57  ;;  %1597 = vst [vmem:[%s2288_s14 + $0x8] sm:$0xff] %v1525_v14   ;;  %v850_v46 = vmul.f32 %v2223_v16, %v2121_v24  ;;  %v2304_v57 = vadd.f32 %v2126_v26, %v834_v28 }
 0x12e   : > { %v1820_v48 = vpop.eup %1819  ;;  %v1100_v17 = vmul.f32 %v1818_v41, %v2162_v53  ;;  %1839 = vpow2.f32 %v971_v1  ;;  %v1520_v52 = vpack.c.bf16 %v1084_v43, %v1083_v60  ;;  %v932_v6 = vsub.f32 0.0, %v900_v20 }
 0x12f   : > { %v1822_v49 = vpop.eup %1821  ;;  %v1039_v13 = vadd.f32 1.0, %v1820_v48  ;;  %1605 = vst [vmem:[%s2288_s14 + $0x48] sm:$0xff] %v1565_v12   ;;  %1841 = vpow2.f32 %v977_v11  ;;  %v916_v40 = vmax.f32 %v2294_v59, -30.0  ;;  %v2307_v63 = vadd.f32 %v2126_v26, %v850_v46 }
 0x130   : > { %v1824_v50 = vpop.eup %1823  ;;  %v1560_v53 = vpack.c.bf16 %v1100_v17, %v1099_v0  ;;  %v1026_v21 = vadd.f32 1.0, %v1822_v49  ;;  %1521 = vst [vmem:[%s2288_s14] sm:$0xff] %v1520_v52   ;;  %v973_v56 = vmul.f32 1.442695, %v932_v6  ;;  %v832_v15 = vmul.f32 %v2121_v24, %v2226_v22 }
 0x131   : > { %v1826_v27 = vpop.eup %1825  ;;  %1843 = vrcp.f32 %v1039_v13  ;;  %v905_v16 = vmax.f32 %v2304_v57, -30.0  ;;  %v848_v36 = vmul.f32 %v2121_v24, %v2228_v25  ;;  %v948_v8 = vsub.f32 0.0, %v916_v40 }
 0x132   : > { %v1828_v39 = vpop.eup %1827  ;;  %1604 = vst [vmem:[%s2288_s14 + $0x40] sm:$0xff] %v1560_v53   ;;  %1845 = vrcp.f32 %v1026_v21  ;;  %v921_v37 = vmax.f32 %v2307_v63, -30.0  ;;  %v2316_v22 = vadd.f32 %v2126_v26, %v832_v15  ;;  %v1089_v25 = vmul.f32 %v1824_v50, %v2171_v18 }
 0x133   : > { %v1830_v55 = vpop.eup %1829  ;;  %1847 = vpow2.f32 %v1009_v44  ;;  %v2319_v43 = vadd.f32 %v2126_v26, %v848_v36  ;;  %v1105_v48 = vmul.f32 %v1826_v27, %v2176_v23  ;;  %v1087_v49 = vmul.f32 %v1828_v39, %v2182_v29 }
 0x134   : > { %v1832_v60 = vpop.eup %1831  ;;  %v1042_v61 = vadd.f32 1.0, %v1830_v55  ;;  %1849 = vpow2.f32 %v1003_v45  ;;  %v937_v45 = vsub.f32 0.0, %v905_v16  ;;  %v953_v14 = vsub.f32 0.0, %v921_v37 }
 0x135   : > { %v1834_v0 = vpop.eup %1833  ;;  %v1024_v1 = vadd.f32 1.0, %v1832_v60  ;;  %1851 = vpow2.f32 %v973_v56  ;;  %v903_v17 = vmax.f32 %v2316_v22, -30.0  ;;  %v1005_v52 = vmul.f32 1.442695, %v948_v8 }
 0x136   : > { %v1836_v3 = vpop.eup %1835  ;;  %1853 = vrcp.f32 %v1042_v61  ;;  %v1040_v4 = vadd.f32 1.0, %v1834_v0  ;;  %v919_v13 = vmax.f32 %v2319_v43, -30.0  ;;  %v983_v53 = vmul.f32 1.442695, %v937_v45 }
 0x137   : > { %v1838_v9 = vpop.eup %1837  ;;  %1855 = vrcp.f32 %v1024_v1  ;;  %v1029_v42 = vadd.f32 1.0, %v1836_v3  ;;  %v835_v21 = vmul.f32 %v2236_v35, %v2121_v24  ;;  %v1015_v23 = vmul.f32 1.442695, %v953_v14 }
 0x138   : > { %v1840_v11 = vpop.eup %1839  ;;  %1857 = vrcp.f32 %v1040_v4  ;;  %v1045_v41 = vadd.f32 1.0, %v1838_v9  ;;  %v935_v50 = vsub.f32 0.0, %v903_v17  ;;  %v851_v27 = vmul.f32 %v2238_v38, %v2121_v24 }
 0x139   : > { %v1027_v12 = vadd.f32 1.0, %v1840_v11  ;;  %v1842_v58 = vpop.eup %1841  ;;  %1859 = vrcp.f32 %v1029_v42  ;;  %v2333_v39 = vadd.f32 %v2126_v26, %v835_v21  ;;  %v951_v35 = vsub.f32 0.0, %v919_v13 }
 0x13a   : > { %1861 = vrcp.f32 %v1045_v41  ;;  %v1030_v20 = vadd.f32 1.0, %v1842_v58  ;;  %v2336_v55 = vadd.f32 %v2126_v26, %v851_v27  ;;  %v849_v0 = vmul.f32 %v2121_v24, %v2242_v54 }
 0x13b   : > { %v1844_v44 = vpop.eup %1843  ;;  %1863 = vrcp.f32 %v1027_v12  ;;  %v906_v38 = vmax.f32 %v2333_v39, -30.0  ;;  %v979_v9 = vmul.f32 1.442695, %v935_v50  ;;  %v1011_v11 = vmul.f32 1.442695, %v951_v35 }
 0x13c   : > { %v1846_v18 = vpop.eup %1845  ;;  %v1103_v29 = vmul.f32 %v1844_v44, %v2185_v30  ;;  %1865 = vrcp.f32 %v1030_v20  ;;  %v833_v30 = vmul.f32 %v2121_v24, %v2240_v47  ;;  %v922_v15 = vmax.f32 %v2336_v55, -30.0 }
 0x13d   : > { %v1848_v6 = vpop.eup %1847  ;;  %v1090_v28 = vmul.f32 %v1846_v18, %v2189_v32  ;;  %1867 = vpow2.f32 %v1005_v52  ;;  %v938_v36 = vsub.f32 0.0, %v906_v38  ;;  %v2351_v37 = vadd.f32 %v2126_v26, %v849_v0 }
 0x13e   : > { %v1850_v40 = vpop.eup %1849  ;;  %v1046_v46 = vadd.f32 1.0, %v1848_v6  ;;  %1869 = vpow2.f32 %v983_v53  ;;  %v2347_v3 = vadd.f32 %v2126_v26, %v833_v30  ;;  %v954_v8 = vsub.f32 0.0, %v922_v15 }
 0x13f   : > { %v1852_v56 = vpop.eup %1851  ;;  %v1535_v60 = vpack.c.bf16 %v1090_v28, %v1089_v25 }
 0x140   : > { %v1854_v32 = vpop.eup %1853  ;;  %1871 = vrcp.f32 %v1046_v46  ;;  %v1028_v61 = vadd.f32 1.0, %v1852_v56  ;;  %v1017_v41 = vmul.f32 1.442695, %v954_v8  ;;  %v904_v12 = vmax.f32 %v2347_v3, -30.0 }
 0x141   : > { %v1856_v1 = vpop.eup %1855  ;;  %1599 = vst [vmem:[%s2288_s14 + $0x18] sm:$0xff] %v1535_v60   ;;  %v1106_v16 = vmul.f32 %v1854_v32, %v2192_v33  ;;  %1873 = vpow2.f32 %v1015_v23  ;;  %v985_v33 = vmul.f32 1.442695, %v938_v36 }
 0x142   : > { %v1858_v4 = vpop.eup %1857  ;;  %v1088_v47 = vmul.f32 %v1856_v1, %v2213_v2  ;;  %1875 = vrcp.f32 %v1028_v61  ;;  %v1043_v2 = vadd.f32 1.0, %v1850_v40  ;;  %v936_v17 = vsub.f32 0.0, %v904_v12 }
 0x143   : > { %v1575_v24 = vpack.c.bf16 %v1106_v16, %v1105_v48  ;;  %v1104_v54 = vmul.f32 %v1858_v4, %v2217_v10  ;;  %v1860_v42 = vpop.eup %1859  ;;  %1877 = vpow2.f32 %v985_v33  ;;  %v920_v48 = vmax.f32 %v2351_v37, -30.0 }
 0x144   : > { %v1530_v45 = vpack.c.bf16 %v1088_v47, %v1087_v49  ;;  %v1862_v14 = vpop.eup %1861  ;;  %1879 = vpow2.f32 %v1017_v41  ;;  %v1093_v49 = vmul.f32 %v1860_v42, %v2231_v31  ;;  %v981_v53 = vmul.f32 1.442695, %v936_v17 }
 0x145   : > { %1607 = vst [vmem:[%s2288_s14 + $0x58] sm:$0xff] %v1575_v24   ;;  %v1570_v25 = vpack.c.bf16 %v1104_v54, %v1103_v29  ;;  %v1864_v26 = vpop.eup %1863  ;;  %1881 = vpow2.f32 %v979_v9  ;;  %v952_v13 = vsub.f32 0.0, %v920_v48  ;;  %v1109_v50 = vmul.f32 %v1862_v14, %v2234_v34 }
 0x146   : > { %1598 = vst [vmem:[%s2288_s14 + $0x10] sm:$0xff] %v1530_v45   ;;  %v1866_v10 = vpop.eup %1865  ;;  %1883 = vpow2.f32 %v1011_v11 }
 0x147   : > { %1606 = vst [vmem:[%s2288_s14 + $0x50] sm:$0xff] %v1570_v25   ;;  %v1868_v58 = vpop.eup %1867  ;;  %v1094_v52 = vmul.f32 %v1866_v10, %v2263_v51  ;;  %1885 = vrcp.f32 %v1043_v2  ;;  %v1013_v6 = vmul.f32 1.442695, %v952_v13  ;;  %v1091_v51 = vmul.f32 %v1864_v26, %v2251_v7 }
 0x148   : > { %v1870_v44 = vpop.eup %1869  ;;  %v1044_v20 = vadd.f32 1.0, %v1868_v58 }
 0x149   : > { %v1545_v18 = vpack.c.bf16 %v1094_v52, %v1093_v49  ;;  %v1033_v29 = vadd.f32 1.0, %v1870_v44 }
 0x14a   : > { %v1872_v21 = vpop.eup %1871  ;;  %1887 = vrcp.f32 %v1044_v20 }
 0x14b   : > { %v1874_v23 = vpop.eup %1873  ;;  %v1110_v27 = vmul.f32 %v1872_v21, %v2266_v5  ;;  %1601 = vst [vmem:[%s2288_s14 + $0x28] sm:$0xff] %v1545_v18   ;;  %1889 = vpow2.f32 %v981_v53 }
 0x14c   : > { %v1876_v31 = vpop.eup %1875  ;;  %v1049_v46 = vadd.f32 1.0, %v1874_v23  ;;  %1891 = vpow2.f32 %v1013_v6 }
 0x14d   : > { %v1585_v28 = vpack.c.bf16 %v1110_v27, %v1109_v50  ;;  %v1092_v40 = vmul.f32 %v1876_v31, %v2283_v62  ;;  %v1878_v35 = vpop.eup %1877  ;;  %1893 = vrcp.f32 %v1033_v29 }
 0x14e   : > { %v1880_v34 = vpop.eup %1879  ;;  %v1034_v5 = vadd.f32 1.0, %v1878_v35  ;;  %1895 = vrcp.f32 %v1049_v46 }
 0x14f   : > { %1609 = vst [vmem:[%s2288_s14 + $0x68] sm:$0xff] %v1585_v28   ;;  %v1540_v56 = vpack.c.bf16 %v1092_v40, %v1091_v51  ;;  %v1882_v60 = vpop.eup %1881  ;;  %v1050_v38 = vadd.f32 1.0, %v1880_v34 }
 0x150   : > { %v1884_v30 = vpop.eup %1883  ;;  %1897 = vrcp.f32 %v1034_v5  ;;  %v1031_v32 = vadd.f32 1.0, %v1882_v60 }
 0x151   : > { %1600 = vst [vmem:[%s2288_s14 + $0x20] sm:$0xff] %v1540_v56   ;;  %v1886_v7 = vpop.eup %1885  ;;  %1899 = vrcp.f32 %v1050_v38  ;;  %v1047_v61 = vadd.f32 1.0, %v1884_v30 }
 0x152   : > { %v1107_v15 = vmul.f32 %v1886_v7, %v2259_v19  ;;  %1901 = vrcp.f32 %v1031_v32 }
 0x153   : > { %1903 = vrcp.f32 %v1047_v61 }
 0x154   : > { %v1888_v62 = vpop.eup %1887 }
 0x155   : > { %v1108_v0 = vmul.f32 %v1888_v62, %v2294_v59  ;;  %v1890_v1 = vpop.eup %1889 }
 0x156   : > { %v1032_v36 = vadd.f32 1.0, %v1890_v1  ;;  %v1892_v4 = vpop.eup %1891 }
 0x157   : > { %v1580_v16 = vpack.c.bf16 %v1108_v0, %v1107_v15  ;;  %v1894_v47 = vpop.eup %1893  ;;  %v1048_v8 = vadd.f32 1.0, %v1892_v4 }
 0x158   : > { %1905 = vrcp.f32 %v1032_v36  ;;  %v1896_v24 = vpop.eup %1895  ;;  %v1097_v59 = vmul.f32 %v1894_v47, %v2304_v57 }
 0x159   : > { %1608 = vst [vmem:[%s2288_s14 + $0x60] sm:$0xff] %v1580_v16   ;;  %1907 = vrcp.f32 %v1048_v8  ;;  %v1113_v33 = vmul.f32 %v1896_v24, %v2307_v63 }
 0x15a   : > { %v1898_v54 = vpop.eup %1897 }
 0x15b   : > { %v1900_v19 = vpop.eup %1899  ;;  %v1098_v9 = vmul.f32 %v1898_v54, %v2333_v39 }
 0x15c   : > { %v1114_v42 = vmul.f32 %v1900_v19, %v2336_v55  ;;  %v1902_v41 = vpop.eup %1901 }
 0x15d   : > { %v1555_v45 = vpack.c.bf16 %v1098_v9, %v1097_v59  ;;  %v1904_v14 = vpop.eup %1903  ;;  %v1095_v2 = vmul.f32 %v1902_v41, %v2316_v22 }
 0x15e   : > { %v1595_v11 = vpack.c.bf16 %v1114_v42, %v1113_v33  ;;  %v1111_v39 = vmul.f32 %v1904_v14, %v2319_v43 }
 0x15f   : > { %1603 = vst [vmem:[%s2288_s14 + $0x38] sm:$0xff] %v1555_v45  }
 0x160   : > { %1611 = vst [vmem:[%s2288_s14 + $0x78] sm:$0xff] %v1595_v11  }
 0x162   : > { %v1906_v25 = vpop.eup %1905 }
 0x163   : > { %v1096_v57 = vmul.f32 %v1906_v25, %v2347_v3  ;;  %v1908_v63 = vpop.eup %1907 }
 0x164   : > { %v1112_v12 = vmul.f32 %v1908_v63, %v2351_v37 }
 0x165   : > { %v1550_v55 = vpack.c.bf16 %v1096_v57, %v1095_v2 }
 0x166   : > { %v1590_v22 = vpack.c.bf16 %v1112_v12, %v1111_v39 }
 0x167   : > { %1602 = vst [vmem:[%s2288_s14 + $0x30] sm:$0xff] %v1550_v55  }
 0x168   : > { %1610 = vst [vmem:[%s2288_s14 + $0x70] sm:$0xff] %v1590_v22  }
 0x169   : > { %1922 = shalt.err (!%p1919_p5)
}
 0x16a   : > { %s1923_s8 = scalar_lea.hbm %s2386_s29, 2048  ;;  %s1927_s11 = scalar_lea.hbm %s2444_s4, 4096 }
 0x16b   : > { %p1924_p6 = scmp.ne.s32.totalorder %s2386_s29, %s1923_s8  ;;  %p1928_p10 = scmp.lt.u32.totalorder %s2386_s29, %s2444_s4 }
 0x16c   : > { %p1929_p11 = scmp.lt.u32.totalorder %s1927_s11, %s1923_s8  ;;  %p1931_p13 = scmp.lt.u32.totalorder %s1923_s8, %s2386_s29 }
 0x16d   : > { %p1925_p7 = pnand %p1924_p6, %p2057_p4 }
 0x16e   : > { %p1930_p12 = por %p1929_p11, %p1928_p10 }
 0x16f   : > { %p1926_p9 = pneg %p1925_p7 }
 0x170   : > { %p1932_p0 = por %p1931_p13, %p1930_p12 }
 0x172   : > { %p1933_p1 = pnand %p1932_p0, %p1926_p9 }
 0x174   : > { %1936 = shalt.err (!%p1933_p1)
}
 0x175   : > { %s1990_s14 = smov 64   ;;  %s1991_s21 = smov 4  }
 0x176   : > { %1700 = dma.vmem_to_hbm [thread:$0]  (%p2057_p4), %s2388_s22, 2048, %s2386_s29, %s2394_s18, %s1990_s14, %s1990_s14, %s1991_s21  }
 0x177 PF: > { %p1706_p2 = scmp.ge.s32.totalorder %s1987_s20, 2  ;;  %s1305_s24 = sand.u32 1, %s1967_s15  }
 0x178   : > { %s1306_s26 = scalar_lea.sflag [#allocation4], %s1305_s24 }
 0x179   : > { %p1703_p3 = pnand %p1706_p2, %p2064_p8 }
 0x17b   : > { %1962 = dma.done.wait (!%p1703_p3), %s1306_s26, 2048  }
 0x17c   : > { %1964 = vsyncadd (!%p1703_p3), %s1306_s26, 4294965248  ;;  %s17_s20 = sadd.s32 1, %s1987_s20   ;;  %s2447_s15 = smov %s1971_s16 }
 0x17d   : > { %p14_p5 = scmp.ge.s32.totalorder %s17_s20, 4   ;;  %s2448_s16 = smov %s1975_s17 }
 0x17e   : > { %s2449_s17 = smov %s2070_s28  ;;  %s2450_s18 = smov %s1983_s19 }
 0x17f   : > { %s2451_s19 = smov %s2453_s23  ;;  %16 = sbr.rel (!%p14_p5) target bundleno = 4 (0x4), region = 88 }
 0x186   :  { %1311 = vsyncpa [#allocation4], 1 }
 0x187   :  { %1313 = vsyncpa [#allocation4 + $0x1], 1 }

</bundles_post_ra>
